<compile_context>
chip_gen: v7x
topology: tpu7x:2x2x1
jax: 0.10.0
libtpu: 0.0.40
codegen_flags: <defaults>
</compile_context>

<pallas_src>
import jax
import jax.numpy as jnp
from jax.experimental import pallas as pl
from jax.experimental.pallas import tpu as pltpu


def _twin_conv_kernel(w_ref, p_ref, b_ref, o_ref):
    # w_ref: (Cout, K)   blended weights (compute dtype)
    # p_ref: (K, TS)     channel-major im2col patches for this spatial tile
    # b_ref: (Cout, 1)   blended bias (f32)
    # o_ref: (Cout, TS)  output tile (writes NCHW layout directly)
    acc = jnp.dot(w_ref[...], p_ref[...], preferred_element_type=jnp.float32)
    acc = acc + b_ref[...]                      # (Cout, TS) + (Cout, 1)
    o_ref[...] = acc.astype(o_ref.dtype)


def _pick_spatial_tile(HW, N, K, Cout, in_bytes, out_bytes,
                       vmem_budget=24 << 20):
    """Largest TS (multiple of 128, dividing H*W) whose double-buffered
    patch + output blocks fit the budget, preferring >=2 total grid blocks
    so both v7x TensorCores get work even at N == 1."""
    cands = [ts for ts in range(128, HW + 1, 128) if HW % ts == 0]
    if not cands:
        return HW  # block == full array dim is always legal

    def fits(ts):
        return 2 * (K * ts * in_bytes + Cout * ts * out_bytes) <= vmem_budget

    good = [ts for ts in cands if fits(ts) and N * (HW // ts) >= 2]
    if good:
        return max(good)
    good = [ts for ts in cands if fits(ts)]
    if good:
        return max(good)
    return cands[0]


def twin_conv(x_nchw, w1_oihw, b1, w2_oihw, b2, r, *,
              compute_dtype=jnp.bfloat16, out_dtype=None):
    """TwinConv forward.  PyTorch layouts: x NCHW, weights OIHW.  Returns NCHW.

    compute_dtype: dtype of patches / weights fed to the MXU (default bf16,
      the native fast path on v5e/v6e/v7x).  Accumulation, bias and the blend
      stay f32.  Pass jnp.float32 for a bit-comparable f32 path.
    out_dtype: output storage dtype (default: x.dtype).
    """
    N, Cin, H, W = x_nchw.shape
    Cout = w1_oihw.shape[0]
    HW = H * W
    K = 9 * Cin
    out_dtype = x_nchw.dtype if out_dtype is None else out_dtype

    # --- fold the blend into a single conv (forward is linear in the weights).
    # jnp ops so a traced / learned `r` also works under jit.
    r = jnp.asarray(r, jnp.float32)
    w_oihw = (1.0 - r) * w1_oihw.astype(jnp.float32) + r * w2_oihw.astype(jnp.float32)
    b = (1.0 - r) * b1.astype(jnp.float32) + r * b2.astype(jnp.float32)

    # OIHW -> OHWI -> (Cout, 9*Cin); column index = (kh*3 + kw)*Cin + cin.
    w_flat = jnp.transpose(w_oihw, (0, 2, 3, 1)).reshape(Cout, K)
    b_2d = b.reshape(Cout, 1)

    # --- channel-major im2col straight from NCHW: (N, 9*Cin, H*W).
    # Channel order matches the weight flattening above.  Cheap for
    # conv_in-style Cin; the reshape H,W -> H*W is metadata-only.
    # TODO(synk): build the 9 taps in-kernel from a halo row tile
    # (sublane slice + pltpu.roll) to drop this materialized 9x tensor.
    x_pad = jnp.pad(x_nchw, ((0, 0), (0, 0), (1, 1), (1, 1)))   # padding=1
    parts = [x_pad[:, :, kh:kh + H, kw:kw + W]
             for kh in range(3) for kw in range(3)]
    patches = jnp.concatenate(parts, axis=1).reshape(N, K, HW)

    if compute_dtype is not None:
        patches = patches.astype(compute_dtype)
        w_flat = w_flat.astype(compute_dtype)

    in_bytes = jnp.dtype(patches.dtype).itemsize
    out_bytes = jnp.dtype(out_dtype).itemsize
    TS = _pick_spatial_tile(HW, N, K, Cout, in_bytes, out_bytes)
    grid = (N, HW // TS)

    out = pl.pallas_call(
        _twin_conv_kernel,
        out_shape=jax.ShapeDtypeStruct((N, Cout, HW), out_dtype),
        grid=grid,
        in_specs=[
            # blended weights / bias: constant block index (resident in VMEM).
            pl.BlockSpec((Cout, K), lambda n, i: (0, 0)),
            # im2col patches: squeezed batch dim, full K, lane-dense TS tile.
            pl.BlockSpec((None, K, TS), lambda n, i: (n, 0, i)),
            pl.BlockSpec((Cout, 1), lambda n, i: (0, 0)),
        ],
        out_specs=pl.BlockSpec((None, Cout, TS), lambda n, i: (n, 0, i)),
        compiler_params=pltpu.CompilerParams(
            dimension_semantics=("parallel", "parallel")),  # megacore-shardable
    )(w_flat, patches, b_2d)

    # Metadata-only reshape back to NCHW — no transpose pass.
    return out.reshape(N, Cout, H, W)

# TODO(synk): forward-only.  A custom VJP must preserve detach() semantics:
# gradients flow only to conv_in_curr (w2/b2) and r, never to w1/b1.


def ref_forward(x_nchw, w1_oihw, b1, w2_oihw, b2, r):
    """Pure-JAX reference (same semantics as the PyTorch module forward)."""
    dn = jax.lax.conv_dimension_numbers(
        x_nchw.shape, w1_oihw.shape, ('NCHW', 'OIHW', 'NCHW'))
    y1 = jax.lax.conv_general_dilated(
        x_nchw, w1_oihw, (1, 1), ((1, 1), (1, 1)), dimension_numbers=dn)
    y1 = y1 + b1[None, :, None, None]
    y2 = jax.lax.conv_general_dilated(
        x_nchw, w2_oihw, (1, 1), ((1, 1), (1, 1)), dimension_numbers=dn)
    y2 = y2 + b2[None, :, None, None]
    return y1 * (1.0 - r) + y2 * r


if __name__ == "__main__":
    # Small synthetic shapes consistent with the module: two Conv2d(Cin, Cout,
    # kernel_size=3, padding=1) layers and a scalar blend factor r.
    N, Cin, H, W = 2, 4, 16, 16
    Cout = 8
    r = 0.3

    key = jax.random.PRNGKey(0)
    k_x, k_w1, k_b1, k_w2, k_b2 = jax.random.split(key, 5)

    x = jax.random.normal(k_x, (N, Cin, H, W), jnp.float32)
    w1 = jax.random.normal(k_w1, (Cout, Cin, 3, 3), jnp.float32) * 0.1
    b1 = jax.random.normal(k_b1, (Cout,), jnp.float32) * 0.1
    w2 = jax.random.normal(k_w2, (Cout, Cin, 3, 3), jnp.float32) * 0.1
    b2 = jax.random.normal(k_b2, (Cout,), jnp.float32) * 0.1

    ref = ref_forward(x, w1, b1, w2, b2, r)

    # f32 compute path (bit-comparable to the PyTorch forward).
    out_f32 = jax.block_until_ready(
        twin_conv(x, w1, b1, w2, b2, r, compute_dtype=jnp.float32))
    assert out_f32.shape == (N, Cout, H, W)
    assert jnp.allclose(out_f32, ref, atol=1e-4, rtol=1e-4)

    # Default bf16 compute path (native MXU path), f32 accumulation.
    out_bf16 = jax.block_until_ready(twin_conv(x, w1, b1, w2, b2, r))
    assert out_bf16.shape == (N, Cout, H, W)
    assert jnp.allclose(out_bf16, ref, atol=5e-2, rtol=5e-2)

    print("KERNEL_OK")
</pallas_src>

<mosaic_0001>
module attributes {stable_mosaic.version = 11 : i64} {
  func.func @_twin_conv_kernel(%arg0: i32, %arg1: i32, %arg2: memref<8x36xf32, #tpu.memory_space<vmem>>, %arg3: memref<1x36x256xf32, #tpu.memory_space<vmem>>, %arg4: memref<8x1xf32, #tpu.memory_space<vmem>>, %arg5: memref<1x8x256xf32, #tpu.memory_space<vmem>>) attributes {dimension_semantics = [#tpu.dimension_semantics<parallel>, #tpu.dimension_semantics<parallel>], iteration_bounds = array<i64: 2, 1>, scalar_prefetch = 0 : i64, scratch_operands = 0 : i64, tpu.core_type = #tpu.core_type<tc>, window_params = [{pipeline_mode = #tpu.pipeline_mode<synchronous>, transform_indices = @transform_0, window_bounds = array<i64: 8, 36>}, {transform_indices = @transform_1, window_bounds = array<i64: 1, 36, 256>}, {pipeline_mode = #tpu.pipeline_mode<synchronous>, transform_indices = @transform_2, window_bounds = array<i64: 8, 1>}, {transform_indices = @transform_3, window_bounds = array<i64: 1, 8, 256>}]} {
    %c0 = arith.constant 0 : index
    %c0_0 = arith.constant 0 : index
    %0 = vector.load %arg2[%c0, %c0_0] : memref<8x36xf32, #tpu.memory_space<vmem>>, vector<8x36xf32>
    %c0_1 = arith.constant 0 : index
    %c0_2 = arith.constant 0 : index
    %c0_3 = arith.constant 0 : index
    %1 = vector.load %arg3[%c0_1, %c0_2, %c0_3] : memref<1x36x256xf32, #tpu.memory_space<vmem>>, vector<1x36x256xf32>
    %2 = vector.shape_cast %1 : vector<1x36x256xf32> to vector<36x256xf32>
    %cst = arith.constant dense<0.000000e+00> : vector<8x256xf32>
    %3 = tpu.matmul %0, %2, %cst {dimension_numbers = #tpu.dot_dimension_numbers<[1], [0], [0], [1], [0, 0, 1, 1], [], []>} : vector<8x36xf32>, vector<36x256xf32>, vector<8x256xf32> -> vector<8x256xf32>
    %c0_4 = arith.constant 0 : index
    %c0_5 = arith.constant 0 : index
    %4 = vector.load %arg4[%c0_4, %c0_5] : memref<8x1xf32, #tpu.memory_space<vmem>>, vector<8x1xf32>
    %5 = vector.broadcast %4 : vector<8x1xf32> to vector<8x256xf32>
    %6 = arith.addf %3, %5 : vector<8x256xf32>
    %c0_6 = arith.constant 0 : index
    %c0_7 = arith.constant 0 : index
    %c0_8 = arith.constant 0 : index
    %7 = vector.load %arg5[%c0_6, %c0_7, %c0_8] : memref<1x8x256xf32, #tpu.memory_space<vmem>>, vector<1x8x256xf32>
    %8 = vector.shape_cast %7 : vector<1x8x256xf32> to vector<8x256xf32>
    %9 = vector.shape_cast %6 : vector<8x256xf32> to vector<1x8x256xf32>
    tpu.vector_store %arg5[%c0_6, %c0_7, %c0_8], %9 {strides = array<i32>} : memref<1x8x256xf32, #tpu.memory_space<vmem>>, vector<1x8x256xf32>,
    return
  }
  func.func @transform_0(%arg0: i32, %arg1: i32) -> (i32, i32) {
    %c0_i32 = arith.constant 0 : i32
    %c0_i32_0 = arith.constant 0 : i32
    %c0_i32_1 = arith.constant 0 : i32
    return %c0_i32, %c0_i32_0 : i32, i32
  }
  func.func @transform_1(%arg0: i32, %arg1: i32) -> (i32, i32, i32) {
    %c0_i32 = arith.constant 0 : i32
    %c0_i32_0 = arith.constant 0 : i32
    return %arg0, %c0_i32, %arg1 : i32, i32, i32
  }
  func.func @transform_2(%arg0: i32, %arg1: i32) -> (i32, i32) {
    %c0_i32 = arith.constant 0 : i32
    %c0_i32_0 = arith.constant 0 : i32
    %c0_i32_1 = arith.constant 0 : i32
    return %c0_i32, %c0_i32_0 : i32, i32
  }
  func.func @transform_3(%arg0: i32, %arg1: i32) -> (i32, i32, i32) {
    %c0_i32 = arith.constant 0 : i32
    %c0_i32_0 = arith.constant 0 : i32
    return %arg0, %c0_i32, %arg1 : i32, i32, i32
  }
}

</mosaic_0001>

<bundles_post_ra>
// kernel: tpu_custom_call.1
= control target key start
LH: loop header
LB: loop body
LE: loop exit
PB: predicated region body
PF: predicated region fallthrough
CT: control target
= control target key end

     0   :  { %8 = vsyncpa [#allocation3], 0  ;;  %s698_s0 = inlined_call_operand.vmem [shape: f32[8,36], index: 0, kind: input, shape index: {}]   ;;  %s699_s1 = inlined_call_operand.vmem [shape: f32[2,36,256], index: 1, kind: input, shape index: {}]   ;;  %s700_s2 = inlined_call_operand.vmem [shape: f32[8,1], index: 2, kind: input, shape index: {}]   ;;  %s701_s3 = inlined_call_operand.hbm [shape: f32[2,8,256], index: 3, kind: output, shape index: {}]  }
   0x1   :  { %10 = vsyncpa [#allocation3 + $0x1], 0  ;;  %s580_s12 = smov 0   ;;  %s582_s13 = smov 0  }
   0x2   :  { %s584_s14 = smov 0   ;;  %s586_s15 = smov 0  }
   0x3   :  { %s588_s16 = smov 0   ;;  %s590_s17 = smov 0  }
   0x4 LB: > { %s394_s18 = sadd.s32 4294967295, %s555_s17   ;;  %s395_s19 = sadd.s32 4294967294, %s555_s17   ;;  %s555_s17 = sphi %s590_s17, %s16_s17   ;;  %s551_s16 = sphi %s588_s16, %s708_s16   ;;  %s547_s15 = sphi %s586_s15, %s707_s15   ;;  %s543_s14 = sphi %s584_s14, %s706_s14   ;;  %s539_s13 = sphi %s582_s13, %s705_s13   ;;  %s535_s12 = sphi %s580_s12, %s704_s12  }
   0x5   : > { %s28_s20 = sadd.s32 1, %s551_s16  ;;  %s107_s21 = sadd.s32 1, %s543_s14 }
   0x6   : > { %p30_p0 = scmp.ge.s32.totalorder %s28_s20, 2  ;;  %p117_p1 = scmp.ne.s32.totalorder %s543_s14, %s539_s13 }
   0x7   : > { %p118_p2 = scmp.eq.s32.totalorder %s394_s18, 1  ;;  %p123_p3 = scmp.ne.s32.totalorder %s539_s13, %s535_s12 }
   0x8   : > { %s710_s20 = smov (%p30_p0, %s28_s20), 0  ;;  %p124_p5 = scmp.eq.s32.totalorder %s395_s19, 1 }
   0x9   : > { %p620_p4 = por %p118_p2, %p117_p1  ;;  %s102_s23 = ssub.s32 %s551_s16, %s710_s20 }
   0xa   : > { %p398_p6 = scmp.ge.s32.totalorder %s555_s17, 1  ;;  %p105_p7 = scmp.eq.s32.totalorder %s102_s23, 0 }
   0xb   : > { %p627_p8 = por %p124_p5, %p123_p3  ;;  %p161_p9 = scmp.lt.s32.totalorder %s555_s17, 3 }
   0xc   : > { %s633_s25 = scalar_select %p105_p7, %s543_s14, %s107_s21  }
   0xd   : > { %p162_p10 = pnand %p398_p6, %p161_p9 }
   0xe   : > { %p190_p11 = scmp.lt.s32.totalorder (!%p162_p10), %s547_s15, 1  ;;  %v557_v0 = vmov (!%p162_p10), 0.0   ;;  %v558_v1 = vmov (!%p162_p10), 0   ;;  %v211_v2 = vld [vmem:[%s700_s2] sm:$0xff] (!%p162_p10)  ;;  %vm221_vm0 = vcmask (!%p162_p10), 1043456   ;;  %vm217_vm1 = vcmask (!%p162_p10), 293888  }
   0xf   : > { %165 = sbr.rel (%p162_p10) target bundleno = 269 (0x10d), region = 32  ;;  %292 = vmatprep.mubr.f32.mxu0 (!%p162_p10), %v557_v0  ;;  %476 = vset.pattern.permute.xlu0 (!%p162_p10), %v558_v1  ;;  %v200_v17 = vld [vmem:[%s698_s0] sm:$0xff] (!%p162_p10)  ;;  %s186_s8 = sand.u32 (!%p162_p10), 1, %s539_s13  }
  0x10   : > { %214 = vperm.xlu0 (!%p162_p10), %476, %v211_v2   ;;  %s399_s9 = sshll.u32 (!%p162_p10), %s186_s8, 4  ;;  %s409_s10 = sshll.u32 (!%p162_p10), %s547_s15, 8 }
  0x11   : > { %s188_s11 = scalar_lea.vmem (!%p162_p10), [#allocation2], %s399_s9  ;;  %s651_s23 = scalar_lea.hbm (!%p162_p10), %s701_s3, %s409_s10 }
  0x12   : > { %s318_s18 = sshll.u32 (!%p162_p10), %s188_s11, 4  ;;  %s302_s26 = scalar_lea.sflag (!%p162_p10), [#allocation3], %s186_s8  ;;  %s653_s18 = int_to_ptr.vmem [resolvable:$true] %s318_s18 }
  0x13   : > { %s559_s27 = smov (!%p162_p10), [#allocation2]  }
  0x16   : > { %s191_s28 = scalar_select %p190_p11, %s547_s15, 1 }
  0x17   : > { %s477_s15 = scalar_lea.vmem %s653_s18, 256 }
  0x18   : > { %s418_s29 = smul.u32 80, %s191_s28  ;;  %p478_p12 = scmp.ne.s32.totalorder %s653_s18, %s477_s15 }
  0x19   : > { %s481_s28 = sshll.u32 %s559_s27, 4  ;;  %s482_s28 = int_to_ptr.vmem [resolvable:$false] %s481_s28 }
  0x1a   : > { %s197_s5 = scalar_lea.vmem %s699_s1, %s418_s29  ;;  %p479_p13 = pnand %p478_p12, %p620_p4 }
  0x1b   : > { %v202_v3 = vld [vmem:[%s197_s5 + $0x8] sm:$0xff]  ;;  %v204_v4 = vld [vmem:[%s197_s5 + $0x18] sm:$0xff]  ;;  %v201_v5 = vld [vmem:[%s197_s5] sm:$0xff]  ;;  %s483_s29 = scalar_lea.vmem %s482_s28, 512  ;;  %p484_p1 = scmp.lt.s32.totalorder %s653_s18, %s482_s28 }
  0x1c   : > { %v410_v6 = vpack.c.bf16 %v204_v4, %v202_v3  ;;  %v203_v7 = vld [vmem:[%s197_s5 + $0x10] sm:$0xff]  ;;  %v206_v8 = vld [vmem:[%s197_s5 + $0x28] sm:$0xff]  ;;  %v208_v9 = vld [vmem:[%s197_s5 + $0x38] sm:$0xff]  ;;  %p480_p0 = pneg %p479_p13  ;;  %p485_p2 = scmp.lt.s32.totalorder %s483_s29, %s477_s15 }
  0x1d   : > { %v412_v10 = vpack.c.bf16 %v203_v7, %v201_v5  ;;  %v414_v11 = vpack.c.bf16 %v208_v9, %v206_v8  ;;  %v205_v12 = vld [vmem:[%s197_s5 + $0x20] sm:$0xff]  ;;  %v207_v13 = vld [vmem:[%s197_s5 + $0x30] sm:$0xff]  ;;  %v210_v15 = vld [vmem:[%s197_s5 + $0x48] sm:$0xf] }
  0x1e   : > { %411 = vmatprep.subr.bf16.mxu0 %v410_v6  ;;  %v416_v14 = vpack.c.bf16 %v207_v13, %v205_v12  ;;  %v209_v16 = vld [vmem:[%s197_s5 + $0x40] sm:$0xf]  ;;  %p486_p3 = por %p485_p2, %p484_p1 }
  0x1f   : > { %413 = vmatpush1.bf16.msra.mxu0 %v412_v10 }
  0x20   : > { %415 = vmatprep.subr.bf16.mxu0 %v414_v11  ;;  %p487_p5 = pnand %p486_p3, %p480_p0 }
  0x23   : > { %417 = vmatpush1.bf16.msra.mxu0 %v416_v14 }
  0x24   : > { %401 = vmatprep.subr.msk.mxu0 %vm221_vm0, %v210_v15 }
  0x27   : > { %402 = vmatpush1.msk.msra.mxu0 %vm221_vm0, %v209_v16 }
  0x28   : > { %403 = vmatmul.mubr.msk.f32.vlgmr.msra.gmra.mrb[0].mxu0 %vm217_vm1, %v200_v17 }
  0x8f   : > { %v215_v18 = vpop.permute.xlu0 %214 }
  0xfb   : > { %v294_v19 = vpop.f32.mrb[0].mxu0 }
  0xfc   : > { %v295_v20 = vadd.f32 %v294_v19, %v215_v18  ;;  %v296_v21 = vpop.f32.mrb[1].mxu0 }
  0xfd   : > { %v297_v22 = vadd.f32 %v296_v21, %v215_v18 }
  0xfe   : > { %299 = vst [vmem:[%s188_s11] sm:$0xff] %v295_v20 }
  0xff   : > { %300 = vst [vmem:[%s188_s11 + $0x8] sm:$0xff] %v297_v22 }
 0x100   : > { %490 = shalt.err (!%p487_p5)
}
 0x101   : > { %s491_s30 = scalar_lea.hbm %s651_s23, 256  ;;  %s495_s6 = scalar_lea.hbm %s701_s3, 512 }
 0x102   : > { %p492_p6 = scmp.ne.s32.totalorder %s651_s23, %s491_s30  ;;  %p496_p10 = scmp.lt.u32.totalorder %s651_s23, %s701_s3 }
 0x103   : > { %p497_p11 = scmp.lt.u32.totalorder %s495_s6, %s491_s30  ;;  %p499_p13 = scmp.lt.u32.totalorder %s491_s30, %s651_s23 }
 0x104   : > { %p493_p7 = pnand %p492_p6, %p620_p4 }
 0x105   : > { %p498_p12 = por %p497_p11, %p496_p10 }
 0x106   : > { %p494_p9 = pneg %p493_p7 }
 0x107   : > { %p500_p0 = por %p499_p13, %p498_p12 }
 0x109   : > { %p501_p1 = pnand %p500_p0, %p494_p9 }
 0x10b   : > { %504 = shalt.err (!%p501_p1)
}
 0x10c   : > { %419 = dma.vmem_to_hbm [thread:$0]  (%p620_p4), %s653_s18, 256, %s651_s23, %s302_s26  }
 0x10d PF: > { %p425_p2 = scmp.ge.s32.totalorder %s555_s17, 2  ;;  %s330_s9 = sand.u32 1, %s535_s12  }
 0x10e   : > { %s331_s10 = scalar_lea.sflag [#allocation3], %s330_s9 }
 0x10f   : > { %p422_p3 = pnand %p425_p2, %p627_p8 }
 0x111   : > { %530 = dma.done.wait (!%p422_p3), %s331_s10, 256  }
 0x112   : > { %532 = vsyncadd (!%p422_p3), %s331_s10, 4294967040  ;;  %s16_s17 = sadd.s32 1, %s555_s17   ;;  %s704_s12 = smov %s539_s13 }
 0x113   : > { %p13_p5 = scmp.ge.s32.totalorder %s16_s17, 4   ;;  %s705_s13 = smov %s543_s14 }
 0x114   : > { %s706_s14 = smov %s633_s25  ;;  %s707_s15 = smov %s551_s16 }
 0x115   : > { %s708_s16 = smov %s710_s20  ;;  %15 = sbr.rel (!%p13_p5) target bundleno = 4 (0x4), region = 67 }
 0x11c   :  { %336 = vsyncpa [#allocation3], 1 }
 0x11d   :  { %338 = vsyncpa [#allocation3 + $0x1], 1 }

</bundles_post_ra>
